<compile_context>
chip_gen: v6e
topology: v6e:2x2x1
jax: 0.10.0
libtpu: 0.0.40
codegen_flags: <defaults>
</compile_context>

<pallas_src>
import functools

import jax
import jax.numpy as jnp
from jax.experimental import pallas as pl
from jax.experimental.pallas import tpu as pltpu


# ---------------- Pallas kernels ----------------

def _stats_kernel(hw, tr, ragged, x_ref, w_ref, stat_ref):
    """Per-block partial column sum / sum-of-squares of the pre-BN conv output.

    x_ref: (tr, C) bf16, w_ref: (C, 4*Cout) bf16, stat_ref: (2, 4*Cout) f32.
    """
    y = jnp.dot(x_ref[...], w_ref[...], preferred_element_type=jnp.float32)
    if ragged:
        # Last row-tile of a batch may hang over H*W: mask the invalid rows so they
        # cannot corrupt the batch statistics (Pallas does not zero OOB block reads).
        j = pl.program_id(1)
        valid = jnp.minimum(hw - j * tr, tr)
        row = jax.lax.broadcasted_iota(jnp.int32, y.shape, 0)
        y = jnp.where(row < valid, y, 0.0)
    stat_ref[0:1, :] = jnp.sum(y, axis=0, keepdims=True)        # partial sum
    stat_ref[1:2, :] = jnp.sum(y * y, axis=0, keepdims=True)    # partial sum of squares


def _convt_bn_relu_kernel(x_ref, w_ref, scale_ref, shift_ref, o_ref):
    """Recompute the K=C matmul (bf16 in, f32 acc), apply BN scale/shift + ReLU, write once."""
    y = jnp.dot(x_ref[...], w_ref[...], preferred_element_type=jnp.float32)
    o_ref[...] = jnp.maximum(y * scale_ref[...] + shift_ref[...], 0.0).astype(o_ref.dtype)


# ---------------- wrapper ----------------

def up_my_forward(x1, x2, weight, bias, gamma, beta, eps=1e-5,
                  tm_max=2048, out_dtype=jnp.float32):
    # Bias cancels exactly under training-mode (batch-stats) BatchNorm; dropping it also
    # makes any padded/garbage rows harmless.  (Not valid for eval-mode BN.)
    del bias

    N, C, H, W = x1.shape
    Cout = C // 2
    C4 = 4 * Cout
    HW = H * W

    # ---- input layout: NCHW -> (N, H*W, C) bf16, one fused XLA copy (cast folded in).
    xf = jnp.transpose(x1, (0, 2, 3, 1)).reshape(N, HW, C).astype(jnp.bfloat16)
    # ConvTranspose2d weight (C_in, C_out, kH, kW) -> (C, 4*Cout), columns ordered (ki, kj, o).
    wf = jnp.transpose(weight, (0, 2, 3, 1)).reshape(C, C4).astype(jnp.bfloat16)

    # ---- row tiling: as large as possible (mem-bound), multiple of 8, grid >= 2 for v7x.
    if HW <= tm_max:
        tr, nb = HW, 1
    else:
        tr = (tm_max // 8) * 8
        nb = pl.cdiv(HW, tr)
    if N * nb < 2 and HW % 16 == 0:        # keep both v7x TensorCores busy
        tr, nb = HW // 2, 2
    ragged = (nb * tr != HW)

    cparams = pltpu.CompilerParams(
        dimension_semantics=("parallel", "parallel"),
        vmem_limit_bytes=48 * 1024 * 1024,   # headroom under v7x's 64 MiB physical VMEM
    )

    # ---- Pass 1: partial batch statistics only (no pre-BN intermediate hits HBM) ----
    stats = pl.pallas_call(
        functools.partial(_stats_kernel, HW, tr, ragged),
        out_shape=jax.ShapeDtypeStruct((N, nb, 2, C4), jnp.float32),
        grid_spec=pltpu.PrefetchScalarGridSpec(
            num_scalar_prefetch=0,
            grid=(N, nb),
            in_specs=[pl.BlockSpec((None, tr, C), lambda n, j: (n, j, 0)),
                      pl.BlockSpec((C, C4), lambda n, j: (0, 0))],
            out_specs=pl.BlockSpec((None, None, 2, C4), lambda n, j: (n, j, 0, 0))),
        compiler_params=cparams,
    )(xf, wf)

    total = jnp.sum(stats, axis=(0, 1))                   # (2, 4*Cout)
    n_elem = jnp.float32(4 * N * HW)                      # N * 2H * 2W per output channel
    ch_sum = total[0].reshape(4, Cout).sum(axis=0)
    ch_sumsq = total[1].reshape(4, Cout).sum(axis=0)
    mean = ch_sum / n_elem
    var = jnp.maximum(ch_sumsq / n_elem - mean * mean, 0.0)    # biased var (PyTorch BN)
    scale = gamma.astype(jnp.float32) / jnp.sqrt(var + eps)
    shift = beta.astype(jnp.float32) - mean * scale
    scale_f = jnp.tile(scale, 4).reshape(1, C4)
    shift_f = jnp.tile(shift, 4).reshape(1, C4)

    # ---- Pass 2: fused convT + BN + ReLU, single lane-dense (4*Cout) write ----
    y_act = pl.pallas_call(
        _convt_bn_relu_kernel,
        out_shape=jax.ShapeDtypeStruct((N, HW, C4), out_dtype),
        grid_spec=pltpu.PrefetchScalarGridSpec(
            num_scalar_prefetch=0,
            grid=(N, nb),
            in_specs=[pl.BlockSpec((None, tr, C), lambda n, j: (n, j, 0)),
                      pl.BlockSpec((C, C4), lambda n, j: (0, 0)),
                      pl.BlockSpec((1, C4), lambda n, j: (0, 0)),
                      pl.BlockSpec((1, C4), lambda n, j: (0, 0))],
            out_specs=pl.BlockSpec((None, tr, C4), lambda n, j: (n, j, 0))),
        compiler_params=cparams,
    )(xf, wf, scale_f, shift_f)

    # (N, HW, 4*Cout) with columns (ki, kj, o) -> NCHW (N, Cout, 2H, 2W) in one transpose.
    # TODO(synk): fold this pixel-shuffle + pad + concat into the pass-2 output layout
    #             (aliased concat buffer) once the in-kernel depth-to-space relayout is safe.
    up = y_act.astype(jnp.float32).reshape(N, H, W, 2, 2, Cout)
    up = jnp.transpose(up, (0, 5, 1, 3, 2, 4)).reshape(N, Cout, 2 * H, 2 * W)

    # F.pad([diffX//2, diffX-diffX//2, diffY//2, diffY-diffY//2]) + channel concat.
    diffY = x2.shape[2] - up.shape[2]
    diffX = x2.shape[3] - up.shape[3]
    up = jnp.pad(up, ((0, 0), (0, 0),
                      (diffY // 2, diffY - diffY // 2),
                      (diffX // 2, diffX - diffX // 2)))
    return jnp.concatenate([x2.astype(up.dtype), up], axis=1)


# ---------------- pure-JAX reference (for sanity check) ----------------

def ref_forward(x1, x2, weight, bias, gamma, beta, eps=1e-5):
    N, C, H, W = x1.shape
    Cout = C // 2
    y = jnp.einsum('nchw,cokl->nohkwl', x1, weight).reshape(N, Cout, 2 * H, 2 * W)
    y = y + bias[None, :, None, None]
    mean = y.mean(axis=(0, 2, 3))
    var = y.var(axis=(0, 2, 3))
    yn = (y - mean[None, :, None, None]) / jnp.sqrt(var + eps)[None, :, None, None]
    yn = yn * gamma[None, :, None, None] + beta[None, :, None, None]
    yn = jnp.maximum(yn, 0.0)
    diffY = x2.shape[2] - yn.shape[2]
    diffX = x2.shape[3] - yn.shape[3]
    yn = jnp.pad(yn, ((0, 0), (0, 0),
                      (diffY // 2, diffY - diffY // 2),
                      (diffX // 2, diffX - diffX // 2)))
    return jnp.concatenate([x2, yn], axis=1)


if __name__ == "__main__":
    # in_channels=64 -> Cout=32 -> 4*Cout=128 (lane-dense output columns).
    N, C, H, W = 2, 64, 16, 16
    Cout = C // 2
    C2 = Cout                          # skip-connection channels

    key = jax.random.PRNGKey(0)
    k1, k2, k3, k4, k5, k6 = jax.random.split(key, 6)
    weight = 0.1 * jax.random.normal(k1, (C, Cout, 2, 2), jnp.float32)
    bias = 0.1 * jax.random.normal(k2, (Cout,), jnp.float32)
    gamma = 1.0 + 0.1 * jax.random.normal(k3, (Cout,), jnp.float32)
    beta = 0.1 * jax.random.normal(k4, (Cout,), jnp.float32)
    x1 = jax.random.normal(k5, (N, C, H, W), jnp.float32)
    x2 = jax.random.normal(k6, (N, C2, 2 * H, 2 * W), jnp.float32)

    out = jax.block_until_ready(up_my_forward(x1, x2, weight, bias, gamma, beta))
    ref = ref_forward(x1, x2, weight, bias, gamma, beta)

    assert out.shape == (N, C2 + Cout, 2 * H, 2 * W), out.shape
    max_err = float(jnp.max(jnp.abs(out - ref)))
    # bf16 MXU inputs -> ~1e-2-scale deviation from the all-f32 reference.
    assert jnp.allclose(out, ref, atol=3e-2, rtol=3e-2), max_err

    print("KERNEL_OK")
</pallas_src>

<mosaic_0001>
module attributes {stable_mosaic.version = 11 : i64} {
  func.func @_stats_kernel(%arg0: i32, %arg1: i32, %arg2: memref<1x256x64xbf16, #tpu.memory_space<vmem>>, %arg3: memref<64x128xbf16, #tpu.memory_space<vmem>>, %arg4: memref<1x1x2x128xf32, #tpu.memory_space<vmem>>) attributes {dimension_semantics = [#tpu.dimension_semantics<parallel>, #tpu.dimension_semantics<parallel>], iteration_bounds = array<i64: 2, 1>, scalar_prefetch = 0 : i64, scratch_operands = 0 : i64, tpu.core_type = #tpu.core_type<tc>, window_params = [{transform_indices = @transform_0, window_bounds = array<i64: 1, 256, 64>}, {pipeline_mode = #tpu.pipeline_mode<synchronous>, transform_indices = @transform_1, window_bounds = array<i64: 64, 128>}, {transform_indices = @transform_2, window_bounds = array<i64: 1, 1, 2, 128>}]} {
    %c0 = arith.constant 0 : index
    %c0_0 = arith.constant 0 : index
    %c0_1 = arith.constant 0 : index
    %0 = vector.load %arg2[%c0, %c0_0, %c0_1] : memref<1x256x64xbf16, #tpu.memory_space<vmem>>, vector<1x256x64xbf16>
    %1 = vector.shape_cast %0 : vector<1x256x64xbf16> to vector<256x64xbf16>
    %c0_2 = arith.constant 0 : index
    %c0_3 = arith.constant 0 : index
    %2 = vector.load %arg3[%c0_2, %c0_3] : memref<64x128xbf16, #tpu.memory_space<vmem>>, vector<64x128xbf16>
    %cst = arith.constant dense<0.000000e+00> : vector<256x128xf32>
    %3 = tpu.matmul %1, %2, %cst {dimension_numbers = #tpu.dot_dimension_numbers<[1], [0], [0], [1], [0, 0, 1, 1], [], []>} : vector<256x64xbf16>, vector<64x128xbf16>, vector<256x128xf32> -> vector<256x128xf32>
    %cst_4 = arith.constant dense<0.000000e+00> : vector<128xf32>
    %4 = vector.multi_reduction <add>, %3, %cst_4 [0] : vector<256x128xf32> to vector<128xf32>
    %5 = vector.shape_cast %4 : vector<128xf32> to vector<1x128xf32>
    %c0_5 = arith.constant 0 : index
    %c0_6 = arith.constant 0 : index
    %c0_7 = arith.constant 0 : index
    %c0_8 = arith.constant 0 : index
    %6 = vector.load %arg4[%c0_5, %c0_6, %c0_7, %c0_8] : memref<1x1x2x128xf32, #tpu.memory_space<vmem>>, vector<1x1x1x128xf32>
    %7 = vector.shape_cast %6 : vector<1x1x1x128xf32> to vector<1x128xf32>
    %8 = vector.shape_cast %5 : vector<1x128xf32> to vector<1x1x1x128xf32>
    tpu.vector_store %arg4[%c0_5, %c0_6, %c0_7, %c0_8], %8 {strides = array<i32>} : memref<1x1x2x128xf32, #tpu.memory_space<vmem>>, vector<1x1x1x128xf32>,
    %9 = arith.mulf %3, %3 : vector<256x128xf32>
    %cst_9 = arith.constant dense<0.000000e+00> : vector<128xf32>
    %10 = vector.multi_reduction <add>, %9, %cst_9 [0] : vector<256x128xf32> to vector<128xf32>
    %11 = vector.shape_cast %10 : vector<128xf32> to vector<1x128xf32>
    %c0_10 = arith.constant 0 : index
    %c0_11 = arith.constant 0 : index
    %c1 = arith.constant 1 : index
    %c0_12 = arith.constant 0 : index
    %12 = vector.load %arg4[%c0_10, %c0_11, %c1, %c0_12] : memref<1x1x2x128xf32, #tpu.memory_space<vmem>>, vector<1x1x1x128xf32>
    %13 = vector.shape_cast %12 : vector<1x1x1x128xf32> to vector<1x128xf32>
    %14 = vector.shape_cast %11 : vector<1x128xf32> to vector<1x1x1x128xf32>
    tpu.vector_store %arg4[%c0_10, %c0_11, %c1, %c0_12], %14 {strides = array<i32>} : memref<1x1x2x128xf32, #tpu.memory_space<vmem>>, vector<1x1x1x128xf32>,
    return
  }
  func.func @transform_0(%arg0: i32, %arg1: i32) -> (i32, i32, i32) {
    %c0_i32 = arith.constant 0 : i32
    %c0_i32_0 = arith.constant 0 : i32
    return %arg0, %arg1, %c0_i32 : i32, i32, i32
  }
  func.func @transform_1(%arg0: i32, %arg1: i32) -> (i32, i32) {
    %c0_i32 = arith.constant 0 : i32
    %c0_i32_0 = arith.constant 0 : i32
    %c0_i32_1 = arith.constant 0 : i32
    return %c0_i32, %c0_i32_0 : i32, i32
  }
  func.func @transform_2(%arg0: i32, %arg1: i32) -> (i32, i32, i32, i32) {
    %c0_i32 = arith.constant 0 : i32
    %c0_i32_0 = arith.constant 0 : i32
    %c0_i32_1 = arith.constant 0 : i32
    return %arg0, %arg1, %c0_i32, %c0_i32_0 : i32, i32, i32, i32
  }
}

</mosaic_0001>

<bundles_post_ra>
// kernel: tpu_custom_call.1
= control target key start
LH: loop header
LB: loop body
LE: loop exit
PB: predicated region body
PF: predicated region fallthrough
CT: control target
= control target key end

     0   :  { %7 = vsyncpa [#allocation3], 0  ;;  %s1175_s0 = inlined_call_operand.vmem [shape: bf16[2,256,64], index: 0, kind: input, shape index: {}]   ;;  %s1176_s1 = inlined_call_operand.vmem [shape: bf16[64,128], index: 1, kind: input, shape index: {}]   ;;  %s1177_s2 = inlined_call_operand.hbm [shape: f32[2,1,2,128], index: 2, kind: output, shape index: {}]  }
   0x1   :  { %9 = vsyncpa [#allocation3 + $0x1], 0  ;;  %s1010_s9 = smov 0   ;;  %s1012_s10 = smov 0  }
   0x2   :  { %s1014_s11 = smov 0   ;;  %s1016_s12 = smov 0  }
   0x3   :  { %s1018_s13 = smov 0   ;;  %s1020_s14 = smov 0  }
   0x4 LB: > { %s724_s15 = sadd.s32 4294967295, %s992_s14   ;;  %s725_s16 = sadd.s32 4294967294, %s992_s14   ;;  %s992_s14 = sphi %s1020_s14, %s15_s14   ;;  %s988_s13 = sphi %s1018_s13, %s1184_s13   ;;  %s984_s12 = sphi %s1016_s12, %s1183_s12   ;;  %s980_s11 = sphi %s1014_s11, %s1182_s11   ;;  %s976_s10 = sphi %s1012_s10, %s1181_s10   ;;  %s972_s9 = sphi %s1010_s9, %s1180_s9  }
   0x5   : > { %s27_s17 = sadd.s32 1, %s988_s13  ;;  %s85_s18 = sadd.s32 1, %s980_s11 }
   0x6   : > { %p29_p0 = scmp.ge.s32.totalorder %s27_s17, 2  ;;  %p95_p1 = scmp.ne.s32.totalorder %s980_s11, %s976_s10 }
   0x7   : > { %p96_p2 = scmp.eq.s32.totalorder %s724_s15, 1  ;;  %p101_p3 = scmp.ne.s32.totalorder %s976_s10, %s972_s9 }
   0x8   : > { %s1186_s17 = smov (%p29_p0, %s27_s17), 0  ;;  %p102_p5 = scmp.eq.s32.totalorder %s725_s16, 1 }
   0x9   : > { %p1050_p4 = por %p96_p2, %p95_p1  ;;  %s80_s20 = ssub.s32 %s988_s13, %s1186_s17 }
   0xa   : > { %p728_p6 = scmp.ge.s32.totalorder %s992_s14, 1  ;;  %p83_p7 = scmp.eq.s32.totalorder %s80_s20, 0 }
   0xb   : > { %p1057_p8 = por %p102_p5, %p101_p3  ;;  %p136_p9 = scmp.lt.s32.totalorder %s992_s14, 3 }
   0xc   : > { %s1063_s22 = scalar_select %p83_p7, %s980_s11, %s85_s18  }
   0xd   : > { %p137_p10 = pnand %p728_p6, %p136_p9 }
   0xe   : > { %p163_p11 = scmp.lt.s32.totalorder (!%p137_p10), %s984_s12, 1  ;;  %s159_s8 = sand.u32 (!%p137_p10), 1, %s976_s10  }
   0xf   : > { %140 = sbr.rel (%p137_p10) target bundleno = 325 (0x145), region = 28  ;;  %s729_s15 = sshll.u32 (!%p137_p10), %s159_s8, 1 }
  0x10   : > { %s769_s16 = sshll.u32 (!%p137_p10), %s984_s12, 5  ;;  %s161_s18 = scalar_lea.vmem (!%p137_p10), [#allocation2], %s729_s15 }
  0x11   : > { %s650_s20 = sshll.u32 (!%p137_p10), %s161_s18, 4  ;;  %s648_s25 = scalar_lea.hbm (!%p137_p10), %s1177_s2, %s769_s16  ;;  %s651_s20 = int_to_ptr.vmem [resolvable:$true] %s650_s20 }
  0x12   : > { %s636_s26 = scalar_lea.sflag (!%p137_p10), [#allocation3], %s159_s8  ;;  %s994_s28 = smov (!%p137_p10), [#allocation2]  }
  0x14   : > { %v896_v0 = vld [vmem:[%s1176_s1 + $0x18] sm:$0xff]   ;;  %v897_v1 = vld [vmem:[%s1176_s1 + $0x10] sm:$0xff]   ;;  %s164_s27 = scalar_select %p163_p11, %s984_s12, 1  ;;  %v898_v2 = vld [vmem:[%s1176_s1 + $0x8] sm:$0xff]   ;;  %vm317_vm0 = vcmask 523264  }
  0x15   : > { %793 = vmatprep.subr.bf16.mxu0 %v896_v0  ;;  %833 = vmatprep.subr.bf16.mxu1 %v896_v0  ;;  %v899_v4 = vld [vmem:[%s1176_s1] sm:$0xff]   ;;  %s920_s12 = sshll.u32 %s994_s28, 4  ;;  %s921_s12 = int_to_ptr.vmem [resolvable:$false] %s920_s12 }
  0x16   : > { %794 = vmatpush3.bf16.msra.mxu0 %v896_v0  ;;  %837 = vmatpush3.bf16.msra.mxu1 %v896_v0  ;;  %s772_s30 = sshll.u32 %s164_s27, 7  ;;  %s916_s27 = scalar_lea.vmem %s651_s20, 32 }
  0x17   : > { %795 = vmatprep.subr.bf16.mxu0 %v897_v1  ;;  %834 = vmatprep.subr.bf16.mxu1 %v897_v1  ;;  %s1079_s5 = scalar_lea.vmem %s1175_s0, %s772_s30  ;;  %p917_p12 = scmp.ne.s32.totalorder %s651_s20, %s916_s27 }
  0x18   : > { %v900_v3 = vld [vmem:[%s1079_s5] sm:$0xff]   ;;  %v901_v5 = vld [vmem:[%s1079_s5 + $0x8] sm:$0xff]   ;;  %v902_v6 = vld [vmem:[%s1079_s5 + $0x10] sm:$0xff]   ;;  %s922_s29 = scalar_lea.vmem %s921_s12, 64  ;;  %p923_p1 = scmp.lt.s32.totalorder %s651_s20, %s921_s12 }
  0x19   : > { %801 = vmatprep.mubr.msk.bf16.mxu0 %vm317_vm0, %v900_v3  ;;  %v908_v7 = vld [vmem:[%s1079_s5 + $0x40] sm:$0xff]   ;;  %v909_v8 = vld [vmem:[%s1079_s5 + $0x48] sm:$0xff]   ;;  %v910_v9 = vld [vmem:[%s1079_s5 + $0x50] sm:$0xff]   ;;  %p918_p13 = pnand %p917_p12, %p1050_p4  ;;  %p924_p2 = scmp.lt.s32.totalorder %s922_s29, %s916_s27 }
  0x1a   : > { %796 = vmatpush3.bf16.msra.mxu0 %v897_v1  ;;  %838 = vmatpush3.bf16.msra.mxu1 %v897_v1  ;;  %v903_v10 = vld [vmem:[%s1079_s5 + $0x18] sm:$0xff]   ;;  %v904_v12 = vld [vmem:[%s1079_s5 + $0x20] sm:$0xff]   ;;  %v905_v14 = vld [vmem:[%s1079_s5 + $0x28] sm:$0xff]  }
  0x1b   : > { %797 = vmatprep.subr.bf16.mxu0 %v898_v2  ;;  %835 = vmatprep.subr.bf16.mxu1 %v898_v2  ;;  %v911_v11 = vld [vmem:[%s1079_s5 + $0x58] sm:$0xff]   ;;  %v912_v13 = vld [vmem:[%s1079_s5 + $0x60] sm:$0xff]   ;;  %v913_v15 = vld [vmem:[%s1079_s5 + $0x68] sm:$0xff]   ;;  %p919_p0 = pneg %p918_p13  ;;  %p925_p3 = por %p924_p2, %p923_p1 }
  0x1c   : > { %817 = vmatprep.mubr.msk.bf16.mxu1 %vm317_vm0, %v908_v7  ;;  %v906_v16 = vld [vmem:[%s1079_s5 + $0x30] sm:$0xff]   ;;  %v907_v18 = vld [vmem:[%s1079_s5 + $0x38] sm:$0xff]  }
  0x1d   : > { %v914_v17 = vld [vmem:[%s1079_s5 + $0x70] sm:$0xff]   ;;  %v915_v19 = vld [vmem:[%s1079_s5 + $0x78] sm:$0xff]   ;;  %p926_p5 = pnand %p925_p3, %p919_p0 }
  0x1e   : > { %798 = vmatpush3.bf16.msra.mxu0 %v898_v2  ;;  %839 = vmatpush3.bf16.msra.mxu1 %v898_v2 }
  0x1f   : > { %799 = vmatprep.subr.bf16.mxu0 %v899_v4  ;;  %836 = vmatprep.subr.bf16.mxu1 %v899_v4 }
  0x22   : > { %800 = vmatpush3.bf16.msra.mxu0 %v899_v4  ;;  %840 = vmatpush3.bf16.msra.mxu1 %v899_v4 }
  0x25   : > { %802 = vmatmul.mubr.msk.bf16.vlgmr.msra.gmra.mxu0 %vm317_vm0, %v901_v5  ;;  %818 = vmatmul.mubr.msk.bf16.vlgmr.msra.gmra.mxu1 %vm317_vm0, %v909_v8 }
  0x26   : > { %805 = vmatprep.mubr.msk.bf16.mxu0 %vm317_vm0, %v902_v6  ;;  %821 = vmatprep.mubr.msk.bf16.mxu1 %vm317_vm0, %v910_v9 }
  0x2d   : > { %806 = vmatmul.mubr.msk.bf16.gmra.mxu0 %vm317_vm0, %v903_v10  ;;  %822 = vmatmul.mubr.msk.bf16.gmra.mxu1 %vm317_vm0, %v911_v11 }
  0x2e   : > { %809 = vmatprep.mubr.msk.bf16.mxu0 %vm317_vm0, %v904_v12  ;;  %825 = vmatprep.mubr.msk.bf16.mxu1 %vm317_vm0, %v912_v13 }
  0x35   : > { %810 = vmatmul.mubr.msk.bf16.gmra.mxu0 %vm317_vm0, %v905_v14  ;;  %826 = vmatmul.mubr.msk.bf16.gmra.mxu1 %vm317_vm0, %v913_v15 }
  0x36   : > { %813 = vmatprep.mubr.msk.bf16.mxu0 %vm317_vm0, %v906_v16  ;;  %829 = vmatprep.mubr.msk.bf16.mxu1 %vm317_vm0, %v914_v17 }
  0x3d   : > { %814 = vmatmul.mubr.msk.bf16.gmra.mxu0 %vm317_vm0, %v907_v18  ;;  %830 = vmatmul.mubr.msk.bf16.gmra.mxu1 %vm317_vm0, %v915_v19 }
  0xe5   : > { %v803_v20 = vpop.f32.mrf.mxu0  ;;  %v1116_v21 = vpop.f32.mrf.mxu1 }
  0xe6   : > { %v567_v31 = vmul.f32 %v803_v20, %v803_v20 }
  0xe7   : > { %v400_v22 = vpop.f32.mrf.mxu0  ;;  %v1118_v24 = vpop.f32.mrf.mxu1 }
  0xe8   : > { %v565_v26 = vmul.f32 %v400_v22, %v400_v22 }
  0xe9   : > { %v804_v23 = vpop.f32.mrf.mxu0  ;;  %v1120_v30 = vpop.f32.mrf.mxu1 }
  0xea   : > { %v568_v35 = vmul.f32 %v804_v23, %v804_v23 }
  0xeb   : > { %v403_v25 = vpop.f32.mrf.mxu0  ;;  %v467_v39 = vpop.f32.mrf.mxu1 }
  0xec   : > { %v527_v27 = vadd.f32 %v403_v25, %v400_v22  ;;  %v566_v28 = vmul.f32 %v403_v25, %v403_v25 }
  0xed   : > { %v807_v29 = vpop.f32.mrf.mxu0  ;;  %v1122_v48 = vpop.f32.mrf.mxu1 }
  0xee   : > { %v528_v32 = vadd.f32 %v803_v20, %v527_v27  ;;  %v597_v33 = vadd.f32 %v566_v28, %v565_v26  ;;  %v571_v49 = vmul.f32 %v807_v29, %v807_v29 }
  0xef   : > { %v416_v34 = vpop.f32.mrf.mxu0  ;;  %v480_v57 = vpop.f32.mrf.mxu1 }
  0xf0   : > { %v598_v36 = vadd.f32 %v597_v33, %v567_v31  ;;  %v529_v37 = vadd.f32 %v804_v23, %v528_v32  ;;  %v569_v41 = vmul.f32 %v416_v34, %v416_v34 }
  0xf1   : > { %v808_v38 = vpop.f32.mrf.mxu0  ;;  %v824_v2 = vpop.f32.mrf.mxu1 }
  0xf2   : > { %v530_v40 = vadd.f32 %v529_v37, %v416_v34  ;;  %v599_v42 = vadd.f32 %v598_v36, %v568_v35  ;;  %v572_v53 = vmul.f32 %v808_v38, %v808_v38  ;;  %v582_v34 = vmul.f32 %v467_v39, %v467_v39 }
  0xf3   : > { %v419_v43 = vpop.f32.mrf.mxu0  ;;  %v483_v11 = vpop.f32.mrf.mxu1  ;;  %v583_v37 = vmul.f32 %v1116_v21, %v1116_v21 }
  0xf4   : > { %v600_v44 = vadd.f32 %v599_v42, %v569_v41  ;;  %v531_v45 = vadd.f32 %v530_v40, %v419_v43  ;;  %v570_v46 = vmul.f32 %v419_v43, %v419_v43  ;;  %v584_v41 = vmul.f32 %v1120_v30, %v1120_v30 }
  0xf5   : > { %v811_v47 = vpop.f32.mrf.mxu0  ;;  %v827_v19 = vpop.f32.mrf.mxu1 }
  0xf6   : > { %v532_v50 = vadd.f32 %v807_v29, %v531_v45  ;;  %v601_v51 = vadd.f32 %v600_v44, %v570_v46  ;;  %v575_v3 = vmul.f32 %v811_v47, %v811_v47  ;;  %v581_v29 = vmul.f32 %v1118_v24, %v1118_v24 }
  0xf7   : > { %v432_v52 = vpop.f32.mrf.mxu0  ;;  %v496_v28 = vpop.f32.mrf.mxu1  ;;  %v585_v46 = vmul.f32 %v480_v57, %v480_v57 }
  0xf8   : > { %v602_v54 = vadd.f32 %v601_v51, %v571_v49  ;;  %v533_v55 = vadd.f32 %v808_v38, %v532_v50  ;;  %v573_v59 = vmul.f32 %v432_v52, %v432_v52  ;;  %v586_v49 = vmul.f32 %v483_v11, %v483_v11 }
  0xf9   : > { %v812_v56 = vpop.f32.mrf.mxu0  ;;  %v828_v36 = vpop.f32.mrf.mxu1  ;;  %v587_v51 = vmul.f32 %v1122_v48, %v1122_v48 }
  0xfa   : > { %v534_v58 = vadd.f32 %v533_v55, %v432_v52  ;;  %v603_v60 = vadd.f32 %v602_v54, %v572_v53  ;;  %v576_v7 = vmul.f32 %v812_v56, %v812_v56  ;;  %v588_v53 = vmul.f32 %v824_v2, %v824_v2 }
  0xfb   : > { %v435_v61 = vpop.f32.mrf.mxu0  ;;  %v499_v44 = vpop.f32.mrf.mxu1 }
  0xfc   : > { %v604_v62 = vadd.f32 %v603_v60, %v573_v59  ;;  %v535_v63 = vadd.f32 %v534_v58, %v435_v61  ;;  %v574_v0 = vmul.f32 %v435_v61, %v435_v61  ;;  %v590_v61 = vmul.f32 %v499_v44, %v499_v44 }
  0xfd   : > { %v815_v1 = vpop.f32.mrf.mxu0  ;;  %v831_v50 = vpop.f32.mrf.mxu1 }
  0xfe   : > { %v536_v4 = vadd.f32 %v811_v47, %v535_v63  ;;  %v605_v5 = vadd.f32 %v604_v62, %v574_v0  ;;  %v579_v20 = vmul.f32 %v815_v1, %v815_v1  ;;  %v591_v63 = vmul.f32 %v827_v19, %v827_v19 }
  0xff   : > { %v448_v6 = vpop.f32.mrf.mxu0 }
 0x100   : > { %v606_v8 = vadd.f32 %v605_v5, %v575_v3  ;;  %v537_v9 = vadd.f32 %v812_v56, %v536_v4  ;;  %v577_v13 = vmul.f32 %v448_v6, %v448_v6  ;;  %v512_v56 = vpop.f32.mrf.mxu1  ;;  %v592_v3 = vmul.f32 %v828_v36, %v828_v36 }
 0x101   : > { %v816_v10 = vpop.f32.mrf.mxu0 }
 0x102   : > { %v538_v12 = vadd.f32 %v537_v9, %v448_v6  ;;  %v607_v14 = vadd.f32 %v606_v8, %v576_v7  ;;  %v580_v25 = vmul.f32 %v816_v10, %v816_v10  ;;  %v832_v62 = vpop.f32.mrf.mxu1  ;;  %v593_v7 = vmul.f32 %v512_v56, %v512_v56 }
 0x103   : > { %v451_v15 = vpop.f32.mrf.mxu0 }
 0x104   : > { %v608_v16 = vadd.f32 %v607_v14, %v577_v13  ;;  %v539_v17 = vadd.f32 %v538_v12, %v451_v15  ;;  %v578_v18 = vmul.f32 %v451_v15, %v451_v15  ;;  %v596_v14 = vmul.f32 %v832_v62, %v832_v62 }
 0x106   : > { %v540_v22 = vadd.f32 %v815_v1, %v539_v17  ;;  %v609_v23 = vadd.f32 %v608_v16, %v578_v18 }
 0x108   : > { %v541_v26 = vadd.f32 %v816_v10, %v540_v22  ;;  %v610_v27 = vadd.f32 %v609_v23, %v579_v20 }
 0x10a   : > { %v611_v31 = vadd.f32 %v610_v27, %v580_v25  ;;  %v542_v32 = vadd.f32 %v541_v26, %v1118_v24 }
 0x10c   : > { %v543_v33 = vadd.f32 %v542_v32, %v467_v39  ;;  %v612_v35 = vadd.f32 %v611_v31, %v581_v29 }
 0x10e   : > { %v544_v38 = vadd.f32 %v1116_v21, %v543_v33  ;;  %v613_v40 = vadd.f32 %v612_v35, %v582_v34 }
 0x110   : > { %v614_v42 = vadd.f32 %v613_v40, %v583_v37  ;;  %v545_v43 = vadd.f32 %v1120_v30, %v544_v38  ;;  %v589_v30 = vmul.f32 %v496_v28, %v496_v28 }
 0x112   : > { %v546_v45 = vadd.f32 %v545_v43, %v480_v57  ;;  %v615_v24 = vadd.f32 %v614_v42, %v584_v41 }
 0x114   : > { %v616_v47 = vadd.f32 %v615_v24, %v585_v46  ;;  %v547_v39 = vadd.f32 %v546_v45, %v483_v11  ;;  %v595_v11 = vmul.f32 %v831_v50, %v831_v50 }
 0x116   : > { %v548_v21 = vadd.f32 %v1122_v48, %v547_v39  ;;  %v617_v52 = vadd.f32 %v616_v47, %v586_v49  ;;  %v515_v48 = vpop.f32.mrf.mxu1 }
 0x117   : > { %v594_v10 = vmul.f32 %v515_v48, %v515_v48 }
 0x118   : > { %v618_v54 = vadd.f32 %v617_v52, %v587_v51  ;;  %v549_v55 = vadd.f32 %v824_v2, %v548_v21 }
 0x11a   : > { %v550_v58 = vadd.f32 %v549_v55, %v496_v28  ;;  %v619_v59 = vadd.f32 %v618_v54, %v588_v53 }
 0x11c   : > { %v620_v60 = vadd.f32 %v619_v59, %v589_v30  ;;  %v551_v57 = vadd.f32 %v550_v58, %v499_v44 }
 0x11e   : > { %v552_v0 = vadd.f32 %v827_v19, %v551_v57  ;;  %v621_v1 = vadd.f32 %v620_v60, %v590_v61 }
 0x120   : > { %v622_v4 = vadd.f32 %v621_v1, %v591_v63  ;;  %v553_v5 = vadd.f32 %v828_v36, %v552_v0 }
 0x122   : > { %v554_v6 = vadd.f32 %v553_v5, %v512_v56  ;;  %v623_v8 = vadd.f32 %v622_v4, %v592_v3 }
 0x124   : > { %v624_v2 = vadd.f32 %v623_v8, %v593_v7  ;;  %v555_v9 = vadd.f32 %v554_v6, %v515_v48 }
 0x126   : > { %v556_v12 = vadd.f32 %v831_v50, %v555_v9  ;;  %v625_v13 = vadd.f32 %v624_v2, %v594_v10 }
 0x128   : > { %v557_v15 = vadd.f32 %v832_v62, %v556_v12  ;;  %v626_v16 = vadd.f32 %v625_v13, %v595_v11 }
 0x12a   : > { %v558_v17 = vrot.slane %v557_v15, 4  ;;  %v627_v18 = vadd.f32 %v626_v16, %v596_v14 }
 0x12c   : > { %v559_v19 = vadd.f32 %v558_v17, %v557_v15  ;;  %v628_v20 = vrot.slane %v627_v18, 4 }
 0x12e   : > { %v560_v22 = vrot.slane %v559_v19, 2  ;;  %v629_v23 = vadd.f32 %v628_v20, %v627_v18 }
 0x130   : > { %v561_v25 = vadd.f32 %v560_v22, %v559_v19  ;;  %v630_v26 = vrot.slane %v629_v23, 2 }
 0x132   : > { %v562_v27 = vrot.slane %v561_v25, 1  ;;  %v631_v28 = vadd.f32 %v630_v26, %v629_v23 }
 0x134   : > { %v563_v29 = vadd.f32 %v562_v27, %v561_v25  ;;  %v632_v31 = vrot.slane %v631_v28, 1 }
 0x136   : > { %564 = vst [vmem:[%s161_s18] sm:$0x1] %v563_v29  ;;  %v633_v32 = vadd.f32 %v632_v31, %v631_v28 }
 0x138   : > { %634 = vst [vmem:[%s161_s18 + $0x1] sm:$0x1] %v633_v32 }
 0x139   : > { %929 = shalt.err (!%p926_p5)
}
 0x13a   : > { %s930_s30 = scalar_lea.hbm %s648_s25, 32  ;;  %s934_s5 = scalar_lea.hbm %s1177_s2, 64 }
 0x13b   : > { %p931_p6 = scmp.ne.s32.totalorder %s648_s25, %s930_s30  ;;  %p935_p10 = scmp.lt.s32.totalorder %s648_s25, %s1177_s2 }
 0x13c   : > { %p936_p11 = scmp.lt.s32.totalorder %s934_s5, %s930_s30 }
 0x13d   : > { %p932_p7 = pnand %p931_p6, %p1050_p4 }
 0x13e   : > { %p937_p12 = por %p936_p11, %p935_p10 }
 0x13f   : > { %p933_p9 = pneg %p932_p7 }
 0x141   : > { %p938_p13 = pnand %p937_p12, %p933_p9 }
 0x143   : > { %941 = shalt.err (!%p938_p13)
}
 0x144   : > { %841 = dma.vmem_to_hbm [thread:$0]  (%p1050_p4), %s651_s20, 32, %s648_s25, %s636_s26  }
 0x145 PF: > { %p847_p0 = scmp.ge.s32.totalorder %s992_s14, 2  ;;  %s662_s8 = sand.u32 1, %s972_s9  }
 0x146   : > { %s663_s15 = scalar_lea.sflag [#allocation3], %s662_s8 }
 0x147   : > { %p844_p1 = pnand %p847_p0, %p1057_p8 }
 0x149   : > { %p845_p2 = pneg %p844_p1 }
 0x14b   : > { %967 = dma.done.wait (%p845_p2), %s663_s15, 32  }
 0x14c   : > { %969 = vsyncadd (%p845_p2), %s663_s15, 4294967264  ;;  %s15_s14 = sadd.s32 1, %s992_s14   ;;  %s1180_s9 = smov %s976_s10 }
 0x14d   : > { %p12_p3 = scmp.ge.s32.totalorder %s15_s14, 4   ;;  %s1181_s10 = smov %s980_s11 }
 0x14e   : > { %s1182_s11 = smov %s1063_s22  ;;  %s1183_s12 = smov %s988_s13 }
 0x14f   : > { %s1184_s13 = smov %s1186_s17  ;;  %14 = sbr.rel (!%p12_p3) target bundleno = 4 (0x4), region = 63 }
 0x154   :  { %668 = vsyncpa [#allocation3], 1 }
 0x155   :  { %670 = vsyncpa [#allocation3 + $0x1], 1 }

</bundles_post_ra>
